<compile_context>
chip_gen: v5e
topology: v5e:2x2
jax: 0.10.0
libtpu: 0.0.40
codegen_flags: <defaults>
</compile_context>

<pallas_src>
import functools

import jax
import jax.numpy as jnp
from jax.experimental import pallas as pl
from jax.experimental.pallas import tpu as pltpu

_INV_SQRT2 = 0.7071067811865476  # 1/sqrt(2), avoids a per-element divide


def mlp_kernel(x_ref, g_ref, b_ref, w1_ref, b1_ref, w2_ref, b2_ref, o_ref,
               xn_ref, acc_ref, *, use_residual):
    # Grid: (token tile i, hidden tile j). x/out blocks are constant over j.
    j = pl.program_id(1)

    @pl.when(j == 0)
    def _init():
        # LayerNorm in f32 (eps matches PyTorch default 1e-5), computed once
        # per token tile and cached in the matmul dtype.
        xf = x_ref[...].astype(jnp.float32)
        mean = jnp.mean(xf, axis=-1, keepdims=True)
        var = jnp.mean(jnp.square(xf - mean), axis=-1, keepdims=True)
        xn = (xf - mean) * jax.lax.rsqrt(var + 1e-5)
        xn = xn * g_ref[...].astype(jnp.float32) + b_ref[...].astype(jnp.float32)
        xn_ref[...] = xn.astype(xn_ref.dtype)
        acc_ref[...] = jnp.zeros_like(acc_ref)

    # fc1 slice: (tm, D) @ (D, th) -> (tm, th), f32 accumulate on the MXU.
    h = jnp.dot(xn_ref[...], w1_ref[...], preferred_element_type=jnp.float32)
    h = h + b1_ref[...].astype(jnp.float32)
    # Exact (erf-based) GELU, matching nn.GELU() default.
    h = 0.5 * h * (1.0 + jax.lax.erf(h * jnp.float32(_INV_SQRT2)))

    # fc2 partial: (tm, th) @ (th, D) accumulated into the f32 scratch.
    acc_ref[...] += jnp.dot(h.astype(w2_ref.dtype), w2_ref[...],
                            preferred_element_type=jnp.float32)

    @pl.when(j == pl.num_programs(1) - 1)
    def _finalize():
        y = acc_ref[...] + b2_ref[...].astype(jnp.float32)
        if use_residual:
            y = y + x_ref[...].astype(jnp.float32)
        o_ref[...] = y.astype(o_ref.dtype)


def _round_up(n, m):
    return ((n + m - 1) // m) * m


def mlp_forward(x, gamma, beta, w1, b1, w2, b2, *, use_residual=True,
                tm=256, th=512):
    """x: [..., D]. Leading dims flattened into token rows.

    Weights/activations are fed to the MXU in their native dtype
    (pass bf16 weights for the fast bf16-in/f32-acc path at real sizes).
    """
    orig_shape = x.shape
    D = x.shape[-1]
    H = w1.shape[1]
    assert w1.shape == (D, H) and w2.shape == (H, D)
    if use_residual:
        assert D == w2.shape[1], "in/out dims must match for residual"

    compute_dtype = w1.dtype  # matmul operand dtype (xn cache / h cast)

    x2 = x.reshape(-1, D)
    T = x2.shape[0]

    # ---- token tiling: clamp tm for tiny inputs, pad rows otherwise ----
    tm_eff = min(tm, _round_up(T, 8))
    Tp = _round_up(T, tm_eff)
    if Tp != T:
        x2 = jnp.pad(x2, ((0, Tp - T), (0, 0)))

    # ---- hidden-dim tiling: full block if small, else pad H to th ----
    if H <= th:
        th_eff, Hp = H, H
    else:
        th_eff = th
        Hp = _round_up(H, th_eff)
    w1p, b1p, w2p = w1, b1, w2
    if Hp != H:
        w1p = jnp.pad(w1, ((0, 0), (0, Hp - H)))
        b1p = jnp.pad(b1, ((0, Hp - H),))
        w2p = jnp.pad(w2, ((0, Hp - H), (0, 0)))

    grid = (Tp // tm_eff, Hp // th_eff)

    # ---- explicit VMEM budget (double-buffered tiles + scratch), v7x-safe ----
    xb = jnp.dtype(x.dtype).itemsize
    wb = jnp.dtype(w1.dtype).itemsize
    cb = jnp.dtype(compute_dtype).itemsize
    est = (2 * tm_eff * D * xb                 # x tiles
           + 2 * tm_eff * D * xb               # out tiles
           + 2 * (D * th_eff + th_eff * D) * wb  # w1/w2 blocks
           + 2 * (2 * D + th_eff + D) * wb     # gamma/beta/b1/b2
           + tm_eff * D * (cb + 4))            # xn cache + f32 accumulator
    vmem_limit = max(32 * 1024 * 1024, min(2 * est, 64 * 1024 * 1024))

    # TODO(synk): for production, pad D to a multiple of 128 (lane-dense
    # output) with a masked LayerNorm; toy D<128 still runs correctly since
    # the block spans the full feature dim.

    kernel = functools.partial(mlp_kernel, use_residual=use_residual)

    out = pl.pallas_call(
        kernel,
        out_shape=jax.ShapeDtypeStruct((Tp, D), x.dtype),
        grid_spec=pltpu.PrefetchScalarGridSpec(
            num_scalar_prefetch=0,
            grid=grid,
            in_specs=[
                pl.BlockSpec((tm_eff, D), lambda i, j: (i, 0)),   # x tile
                pl.BlockSpec((1, D), lambda i, j: (0, 0)),        # ln gamma
                pl.BlockSpec((1, D), lambda i, j: (0, 0)),        # ln beta
                pl.BlockSpec((D, th_eff), lambda i, j: (0, j)),   # fc1 w slice
                pl.BlockSpec((1, th_eff), lambda i, j: (0, j)),   # fc1 b slice
                pl.BlockSpec((th_eff, D), lambda i, j: (j, 0)),   # fc2 w slice
                pl.BlockSpec((1, D), lambda i, j: (0, 0)),        # fc2 bias
            ],
            out_specs=pl.BlockSpec((tm_eff, D), lambda i, j: (i, 0)),
            scratch_shapes=[
                pltpu.VMEM((tm_eff, D), compute_dtype),   # cached LN output
                pltpu.VMEM((tm_eff, D), jnp.float32),     # fc2 accumulator
            ],
        ),
        compiler_params=pltpu.CompilerParams(
            dimension_semantics=("parallel", "arbitrary"),
            vmem_limit_bytes=int(vmem_limit),
        ),
    )(x2, gamma.reshape(1, D), beta.reshape(1, D),
      w1p, b1p.reshape(1, Hp), w2p, b2.reshape(1, D))

    if Tp != T:
        out = out[:T]
    return out.reshape(orig_shape)


def mlp_reference(x, gamma, beta, w1, b1, w2, b2, use_residual=True):
    xf = x.astype(jnp.float32)
    mean = jnp.mean(xf, axis=-1, keepdims=True)
    var = jnp.mean(jnp.square(xf - mean), axis=-1, keepdims=True)
    xn = (xf - mean) / jnp.sqrt(var + 1e-5) * gamma + beta
    h = xn @ w1 + b1
    h = jax.nn.gelu(h, approximate=False)
    y = h @ w2 + b2
    if use_residual:
        y = y + xf
    return y.astype(x.dtype)


if __name__ == "__main__":
    key = jax.random.PRNGKey(0)
    B, S, D, H = 2, 8, 32, 64   # in_dim == out_dim (use_residual=True)
    k = jax.random.split(key, 7)

    x = jax.random.normal(k[0], (B, S, D), dtype=jnp.float32)
    gamma = jnp.ones((D,), jnp.float32)
    beta = jnp.zeros((D,), jnp.float32)
    # deterministic "Linear"-style init
    w1 = jax.random.uniform(k[1], (D, H), jnp.float32, -1.0, 1.0) / jnp.sqrt(D)
    b1 = jax.random.uniform(k[2], (H,), jnp.float32, -1.0, 1.0) / jnp.sqrt(D)
    w2 = jax.random.uniform(k[3], (H, D), jnp.float32, -1.0, 1.0) / jnp.sqrt(H)
    b2 = jax.random.uniform(k[4], (D,), jnp.float32, -1.0, 1.0) / jnp.sqrt(H)

    out = mlp_forward(x, gamma, beta, w1, b1, w2, b2)
    jax.block_until_ready(out)

    ref = mlp_reference(x, gamma, beta, w1, b1, w2, b2)
    assert out.shape == x.shape
    assert jnp.allclose(out, ref, atol=1e-4, rtol=1e-4), "mismatch vs reference"
    print("KERNEL_OK")
</pallas_src>

<mosaic_0001>
module attributes {stable_mosaic.version = 11 : i64} {
  func.func @mlp_kernel(%arg0: i32, %arg1: i32, %arg2: memref<16x32xf32, #tpu.memory_space<vmem>>, %arg3: memref<1x32xf32, #tpu.memory_space<vmem>>, %arg4: memref<1x32xf32, #tpu.memory_space<vmem>>, %arg5: memref<32x64xf32, #tpu.memory_space<vmem>>, %arg6: memref<1x64xf32, #tpu.memory_space<vmem>>, %arg7: memref<64x32xf32, #tpu.memory_space<vmem>>, %arg8: memref<1x32xf32, #tpu.memory_space<vmem>>, %arg9: memref<16x32xf32, #tpu.memory_space<vmem>>, %arg10: memref<16x32xf32, #tpu.memory_space<vmem>>, %arg11: memref<16x32xf32, #tpu.memory_space<vmem>>) attributes {dimension_semantics = [#tpu.dimension_semantics<parallel>, #tpu.dimension_semantics<arbitrary>], iteration_bounds = array<i64: 1, 1>, scalar_prefetch = 0 : i64, scratch_operands = 2 : i64, tpu.core_type = #tpu.core_type<tc>, window_params = [{transform_indices = @transform_0, window_bounds = array<i64: 16, 32>}, {pipeline_mode = #tpu.pipeline_mode<synchronous>, transform_indices = @transform_1, window_bounds = array<i64: 1, 32>}, {pipeline_mode = #tpu.pipeline_mode<synchronous>, transform_indices = @transform_2, window_bounds = array<i64: 1, 32>}, {transform_indices = @transform_3, window_bounds = array<i64: 32, 64>}, {transform_indices = @transform_4, window_bounds = array<i64: 1, 64>}, {transform_indices = @transform_5, window_bounds = array<i64: 64, 32>}, {pipeline_mode = #tpu.pipeline_mode<synchronous>, transform_indices = @transform_6, window_bounds = array<i64: 1, 32>}, {transform_indices = @transform_7, window_bounds = array<i64: 16, 32>}]} {
    %c0_i32 = arith.constant 0 : i32
    %0 = arith.cmpi eq, %arg1, %c0_i32 : i32
    %1 = arith.extui %0 : i1 to i32
    %c0_i32_0 = arith.constant 0 : i32
    %2 = arith.cmpi ne, %1, %c0_i32_0 : i32
    scf.if %2 {
      %c0_18 = arith.constant 0 : index
      %c0_19 = arith.constant 0 : index
      %25 = vector.load %arg2[%c0_18, %c0_19] : memref<16x32xf32, #tpu.memory_space<vmem>>, vector<16x32xf32>
      %cst_20 = arith.constant dense<0.000000e+00> : vector<16xf32>
      %26 = vector.multi_reduction <add>, %25, %cst_20 [1] : vector<16x32xf32> to vector<16xf32>
      %27 = vector.shape_cast %26 : vector<16xf32> to vector<16x1xf32>
      %cst_21 = arith.constant 3.200000e+01 : f32
      %28 = vector.broadcast %cst_21 : f32 to vector<16x1xf32>
      %29 = arith.divf %27, %28 : vector<16x1xf32>
      %30 = vector.broadcast %29 : vector<16x1xf32> to vector<16x32xf32>
      %31 = arith.subf %25, %30 : vector<16x32xf32>
      %32 = arith.mulf %31, %31 : vector<16x32xf32>
      %cst_22 = arith.constant dense<0.000000e+00> : vector<16xf32>
      %33 = vector.multi_reduction <add>, %32, %cst_22 [1] : vector<16x32xf32> to vector<16xf32>
      %34 = vector.shape_cast %33 : vector<16xf32> to vector<16x1xf32>
      %cst_23 = arith.constant 3.200000e+01 : f32
      %35 = vector.broadcast %cst_23 : f32 to vector<16x1xf32>
      %36 = arith.divf %34, %35 : vector<16x1xf32>
      %37 = vector.broadcast %29 : vector<16x1xf32> to vector<16x32xf32>
      %38 = arith.subf %25, %37 : vector<16x32xf32>
      %cst_24 = arith.constant 9.99999974E-6 : f32
      %39 = vector.broadcast %cst_24 : f32 to vector<16x1xf32>
      %40 = arith.addf %36, %39 : vector<16x1xf32>
      %41 = math.rsqrt %40 : vector<16x1xf32>
      %42 = vector.broadcast %41 : vector<16x1xf32> to vector<16x32xf32>
      %43 = arith.mulf %38, %42 : vector<16x32xf32>
      %c0_25 = arith.constant 0 : index
      %c0_26 = arith.constant 0 : index
      %44 = vector.load %arg3[%c0_25, %c0_26] : memref<1x32xf32, #tpu.memory_space<vmem>>, vector<1x32xf32>
      %45 = vector.broadcast %44 : vector<1x32xf32> to vector<16x32xf32>
      %46 = arith.mulf %43, %45 : vector<16x32xf32>
      %c0_27 = arith.constant 0 : index
      %c0_28 = arith.constant 0 : index
      %47 = vector.load %arg4[%c0_27, %c0_28] : memref<1x32xf32, #tpu.memory_space<vmem>>, vector<1x32xf32>
      %48 = vector.broadcast %47 : vector<1x32xf32> to vector<16x32xf32>
      %49 = arith.addf %46, %48 : vector<16x32xf32>
      %c0_29 = arith.constant 0 : index
      %c0_30 = arith.constant 0 : index
      %50 = vector.load %arg10[%c0_29, %c0_30] : memref<16x32xf32, #tpu.memory_space<vmem>>, vector<16x32xf32>
      tpu.vector_store %arg10[%c0_29, %c0_30], %49 {strides = array<i32>} : memref<16x32xf32, #tpu.memory_space<vmem>>, vector<16x32xf32>,
      %cst_31 = arith.constant 0.000000e+00 : f32
      %51 = vector.broadcast %cst_31 : f32 to vector<16x32xf32>
      %c0_32 = arith.constant 0 : index
      %c0_33 = arith.constant 0 : index
      %52 = vector.load %arg11[%c0_32, %c0_33] : memref<16x32xf32, #tpu.memory_space<vmem>>, vector<16x32xf32>
      tpu.vector_store %arg11[%c0_32, %c0_33], %51 {strides = array<i32>} : memref<16x32xf32, #tpu.memory_space<vmem>>, vector<16x32xf32>,
    } else {
    }
    %c0 = arith.constant 0 : index
    %c0_1 = arith.constant 0 : index
    %3 = vector.load %arg10[%c0, %c0_1] : memref<16x32xf32, #tpu.memory_space<vmem>>, vector<16x32xf32>
    %c0_2 = arith.constant 0 : index
    %c0_3 = arith.constant 0 : index
    %4 = vector.load %arg5[%c0_2, %c0_3] : memref<32x64xf32, #tpu.memory_space<vmem>>, vector<32x64xf32>
    %cst = arith.constant dense<0.000000e+00> : vector<16x64xf32>
    %5 = tpu.matmul %3, %4, %cst {dimension_numbers = #tpu.dot_dimension_numbers<[1], [0], [0], [1], [0, 0, 1, 1], [], []>} : vector<16x32xf32>, vector<32x64xf32>, vector<16x64xf32> -> vector<16x64xf32>
    %c0_4 = arith.constant 0 : index
    %c0_5 = arith.constant 0 : index
    %6 = vector.load %arg6[%c0_4, %c0_5] : memref<1x64xf32, #tpu.memory_space<vmem>>, vector<1x64xf32>
    %7 = vector.broadcast %6 : vector<1x64xf32> to vector<16x64xf32>
    %8 = arith.addf %5, %7 : vector<16x64xf32>
    %cst_6 = arith.constant 5.000000e-01 : f32
    %9 = vector.broadcast %cst_6 : f32 to vector<16x64xf32>
    %10 = arith.mulf %9, %8 : vector<16x64xf32>
    %cst_7 = arith.constant 0.707106769 : f32
    %11 = vector.broadcast %cst_7 : f32 to vector<16x64xf32>
    %12 = arith.mulf %8, %11 : vector<16x64xf32>
    %13 = math.erf %12 : vector<16x64xf32>
    %cst_8 = arith.constant 1.000000e+00 : f32
    %14 = vector.broadcast %cst_8 : f32 to vector<16x64xf32>
    %15 = arith.addf %14, %13 : vector<16x64xf32>
    %16 = arith.mulf %10, %15 : vector<16x64xf32>
    %c0_9 = arith.constant 0 : index
    %c0_10 = arith.constant 0 : index
    %17 = vector.load %arg11[%c0_9, %c0_10] : memref<16x32xf32, #tpu.memory_space<vmem>>, vector<16x32xf32>
    %c0_11 = arith.constant 0 : index
    %c0_12 = arith.constant 0 : index
    %18 = vector.load %arg7[%c0_11, %c0_12] : memref<64x32xf32, #tpu.memory_space<vmem>>, vector<64x32xf32>
    %cst_13 = arith.constant dense<0.000000e+00> : vector<16x32xf32>
    %19 = tpu.matmul %16, %18, %cst_13 {dimension_numbers = #tpu.dot_dimension_numbers<[1], [0], [0], [1], [0, 0, 1, 1], [], []>} : vector<16x64xf32>, vector<64x32xf32>, vector<16x32xf32> -> vector<16x32xf32>
    %20 = arith.addf %17, %19 : vector<16x32xf32>
    %c0_14 = arith.constant 0 : index
    %c0_15 = arith.constant 0 : index
    %21 = vector.load %arg11[%c0_14, %c0_15] : memref<16x32xf32, #tpu.memory_space<vmem>>, vector<16x32xf32>
    tpu.vector_store %arg11[%c0_14, %c0_15], %20 {strides = array<i32>} : memref<16x32xf32, #tpu.memory_space<vmem>>, vector<16x32xf32>,
    %c0_i32_16 = arith.constant 0 : i32
    %22 = arith.cmpi eq, %arg1, %c0_i32_16 : i32
    %23 = arith.extui %22 : i1 to i32
    %c0_i32_17 = arith.constant 0 : i32
    %24 = arith.cmpi ne, %23, %c0_i32_17 : i32
    scf.if %24 {
      %c0_18 = arith.constant 0 : index
      %c0_19 = arith.constant 0 : index
      %25 = vector.load %arg11[%c0_18, %c0_19] : memref<16x32xf32, #tpu.memory_space<vmem>>, vector<16x32xf32>
      %c0_20 = arith.constant 0 : index
      %c0_21 = arith.constant 0 : index
      %26 = vector.load %arg8[%c0_20, %c0_21] : memref<1x32xf32, #tpu.memory_space<vmem>>, vector<1x32xf32>
      %27 = vector.broadcast %26 : vector<1x32xf32> to vector<16x32xf32>
      %28 = arith.addf %25, %27 : vector<16x32xf32>
      %c0_22 = arith.constant 0 : index
      %c0_23 = arith.constant 0 : index
      %29 = vector.load %arg2[%c0_22, %c0_23] : memref<16x32xf32, #tpu.memory_space<vmem>>, vector<16x32xf32>
      %30 = arith.addf %28, %29 : vector<16x32xf32>
      %c0_24 = arith.constant 0 : index
      %c0_25 = arith.constant 0 : index
      %31 = vector.load %arg9[%c0_24, %c0_25] : memref<16x32xf32, #tpu.memory_space<vmem>>, vector<16x32xf32>
      tpu.vector_store %arg9[%c0_24, %c0_25], %30 {strides = array<i32>} : memref<16x32xf32, #tpu.memory_space<vmem>>, vector<16x32xf32>,
    } else {
    }
    return
  }
  func.func @transform_0(%arg0: i32, %arg1: i32) -> (i32, i32) {
    %c0_i32 = arith.constant 0 : i32
    %c0_i32_0 = arith.constant 0 : i32
    return %arg0, %c0_i32 : i32, i32
  }
  func.func @transform_1(%arg0: i32, %arg1: i32) -> (i32, i32) {
    %c0_i32 = arith.constant 0 : i32
    %c0_i32_0 = arith.constant 0 : i32
    %c0_i32_1 = arith.constant 0 : i32
    return %c0_i32, %c0_i32_0 : i32, i32
  }
  func.func @transform_2(%arg0: i32, %arg1: i32) -> (i32, i32) {
    %c0_i32 = arith.constant 0 : i32
    %c0_i32_0 = arith.constant 0 : i32
    %c0_i32_1 = arith.constant 0 : i32
    return %c0_i32, %c0_i32_0 : i32, i32
  }
  func.func @transform_3(%arg0: i32, %arg1: i32) -> (i32, i32) {
    %c0_i32 = arith.constant 0 : i32
    %c0_i32_0 = arith.constant 0 : i32
    return %c0_i32, %arg1 : i32, i32
  }
  func.func @transform_4(%arg0: i32, %arg1: i32) -> (i32, i32) {
    %c0_i32 = arith.constant 0 : i32
    %c0_i32_0 = arith.constant 0 : i32
    return %c0_i32, %arg1 : i32, i32
  }
  func.func @transform_5(%arg0: i32, %arg1: i32) -> (i32, i32) {
    %c0_i32 = arith.constant 0 : i32
    %c0_i32_0 = arith.constant 0 : i32
    return %arg1, %c0_i32 : i32, i32
  }
  func.func @transform_6(%arg0: i32, %arg1: i32) -> (i32, i32) {
    %c0_i32 = arith.constant 0 : i32
    %c0_i32_0 = arith.constant 0 : i32
    %c0_i32_1 = arith.constant 0 : i32
    return %c0_i32, %c0_i32_0 : i32, i32
  }
  func.func @transform_7(%arg0: i32, %arg1: i32) -> (i32, i32) {
    %c0_i32 = arith.constant 0 : i32
    %c0_i32_0 = arith.constant 0 : i32
    return %arg0, %c0_i32 : i32, i32
  }
}

</mosaic_0001>

<bundles_post_ra>
// kernel: tpu_custom_call.1
= control target key start
LH: loop header
LB: loop body
LE: loop exit
PB: predicated region body
PF: predicated region fallthrough
CT: control target
= control target key end

     0   :  { %vm33_vm0 = vcmask 261120   ;;  %s539_s0 = inlined_call_operand.vmem [shape: f32[16,32], index: 0, kind: input, shape index: {}]   ;;  %s540_s1 = inlined_call_operand.vmem [shape: f32[1,32], index: 1, kind: input, shape index: {}]   ;;  %s541_s2 = inlined_call_operand.vmem [shape: f32[1,32], index: 2, kind: input, shape index: {}]   ;;  %s542_s3 = inlined_call_operand.vmem [shape: f32[32,64], index: 3, kind: input, shape index: {}]   ;;  %s543_s4 = inlined_call_operand.vmem [shape: f32[1,64], index: 4, kind: input, shape index: {}]   ;;  %s544_s5 = inlined_call_operand.vmem [shape: f32[64,32], index: 5, kind: input, shape index: {}]   ;;  %s545_s6 = inlined_call_operand.vmem [shape: f32[1,32], index: 6, kind: input, shape index: {}]   ;;  %s546_s7 = inlined_call_operand.hbm [shape: f32[16,32], index: 7, kind: output, shape index: {}]  }
   0x1   :  { %v419_v0 = vld [vmem:[%s539_s0 + $0x8] sm:$0xff] }
   0x2   :  { %v37_v1 = vsel %vm33_vm0, %v419_v0, 0.0 }
   0x3   :  { %38 = vadd.xlane.f32.xlu0 %v37_v1 }
   0x4   :  { %12 = vsyncpa [#allocation5], 0  ;;  %v426_v2 = vld [vmem:[%s539_s0] sm:$0xff]  ;;  %v371_v4 = vmov 32.0   ;;  %v106_v21 = vld [vmem:[%s542_s3 + $0x18] sm:$0xff]  ;;  %s373_s30 = smov [#allocation4]  }
   0x5   :  { %v34_v3 = vsel %vm33_vm0, %v426_v2, 0.0  ;;  %335 = vrcp.f32 %v371_v4  ;;  %314 = vmatpush.msra.mxu3 %v106_v21  ;;  %130 = vmatpush.msra.mxu0 %v106_v21  ;;  %v105_v22 = vld [vmem:[%s542_s3 + $0x10] sm:$0xff]  ;;  %v104_v25 = vld [vmem:[%s542_s3 + $0x8] sm:$0xff]  ;;  %v103_v27 = vld [vmem:[%s542_s3] sm:$0xff]  ;;  %s294_s8 = sshll.u32 %s373_s30, 4  ;;  %s296_s11 = sshll.u32 %s546_s7, 4  ;;  %s295_s8 = int_to_ptr.vmem [resolvable:$true] %s294_s8  ;;  %s297_s11 = int_to_ptr.hbm [resolvable:$true] %s296_s11 }
   0x6   :  { %v331_v39 = vld [vmem:[%s540_s1] ss:$0 sm:$0xff]  ;;  %s375_s12 = smov 8  }
   0x7   :  { %315 = vmatpush.msra.mxu3 %v105_v22  ;;  %131 = vmatpush.msra.mxu0 %v105_v22  ;;  %v332_v42 = vld [vmem:[%s541_s2] ss:$0 sm:$0xff]  ;;  %v234_v22 = vld [vmem:[%s544_s5 + $0x18] sm:$0xff] }
   0x8   :  { %v333_v55 = vld [vmem:[%s543_s4] ss:$0 sm:$0xff] }
   0x9   :  { %316 = vmatpush.msra.mxu3 %v104_v25  ;;  %132 = vmatpush.msra.mxu0 %v104_v25 }
   0xb   :  { %35 = vadd.xlane.f32.xlu0 %v34_v3  ;;  %v336_v5 = vpop.eup %335  ;;  %317 = vmatpush.msra.mxu3 %v103_v27  ;;  %v238_v3 = vld [vmem:[%s544_s5 + $0x38] sm:$0xff] }
   0xc   :  { %v41_v6 = vmul.f32 32.0, %v336_v5  ;;  %vm45_vm1 = vweird.f32 %v336_v5  ;;  %133 = vmatpush.msra.mxu0 %v103_v27  ;;  %318 = vmatpush.msra.mxu2 %v238_v3  ;;  %v232_v27 = vld [vmem:[%s544_s5 + $0x8] sm:$0xff] }
   0xd   :  { %254 = vmatpush.msra.mxu1 %v238_v3 }
   0xe   :  { %v42_v7 = vsub.f32 1.0, %v41_v6 }
  0x10   :  { %v43_v8 = vmul.f32 %v336_v5, %v42_v7  ;;  %v237_v7 = vld [vmem:[%s544_s5 + $0x30] sm:$0xff] }
  0x11   :  { %319 = vmatpush.msra.mxu2 %v237_v7  ;;  %255 = vmatpush.msra.mxu1 %v237_v7 }
  0x12   :  { %v44_v9 = vadd.f32 %v336_v5, %v43_v8 }
  0x14   :  { %v46_v10 = vsel %vm45_vm1, %v336_v5, %v44_v9  ;;  %vm239_vm1 = vcmask 523264  }
  0x76   :  { %v39_v11 = vpop.xlane.xlu0 %38 }
  0x77   :  { %v48_v12 = vmul.f32 %v46_v10, %v39_v11 }
  0x79   :  { %v50_v13 = vsub.f32 %v419_v0, %v48_v12  ;;  %v236_v12 = vld [vmem:[%s544_s5 + $0x28] sm:$0xff] }
  0x7a   :  { %320 = vmatpush.msra.mxu2 %v236_v12  ;;  %256 = vmatpush.msra.mxu1 %v236_v12 }
  0x7b   :  { %v52_v14 = vmul.f32 %v50_v13, %v50_v13 }
  0x7d   :  { %v56_v15 = vsel %vm33_vm0, %v52_v14, 0.0 }
  0x7e   :  { %57 = vadd.xlane.f32.xlu1 %v56_v15  ;;  %v36_v16 = vpop.xlane.xlu0 %35 }
  0x7f   :  { %v47_v17 = vmul.f32 %v46_v10, %v36_v16 }
  0x81   :  { %v49_v18 = vsub.f32 %v426_v2, %v47_v17  ;;  %v235_v17 = vld [vmem:[%s544_s5 + $0x20] sm:$0xff] }
  0x82   :  { %321 = vmatpush.msra.mxu2 %v235_v17  ;;  %257 = vmatpush.msra.mxu1 %v235_v17 }
  0x83   :  { %v51_v19 = vmul.f32 %v49_v18, %v49_v18 }
  0x84   :  { %322 = vmatpush.msra.mxu2 %v234_v22  ;;  %258 = vmatpush.msra.mxu1 %v234_v22 }
  0x85   :  { %v53_v20 = vsel %vm33_vm0, %v51_v19, 0.0 }
  0x86   :  { %54 = vadd.xlane.f32.xlu1 %v53_v20 }
  0xf1   :  { %v58_v23 = vpop.xlane.xlu1 %57 }
  0xf2   :  { %v60_v24 = vmul.f32 %v58_v23, %v46_v10 }
  0xf4   :  { %v62_v26 = vadd.f32 1e-05, %v60_v24  ;;  %v233_v24 = vld [vmem:[%s544_s5 + $0x10] sm:$0xff] }
  0xf5   :  { %323 = vmatpush.msra.mxu2 %v233_v24  ;;  %259 = vmatpush.msra.mxu1 %v233_v24 }
  0xf6   :  { %337 = vrsqrt.f32 %v62_v26  ;;  %vm79_vm3 = vweird.f32 %v62_v26 }
  0xf7   :  { %324 = vmatpush.msra.mxu2 %v232_v27  ;;  %260 = vmatpush.msra.mxu1 %v232_v27 }
  0xf9   :  { %v55_v28 = vpop.xlane.xlu1 %54 }
  0xfa   :  { %v59_v29 = vmul.f32 %v55_v28, %v46_v10 }
  0xfc   :  { %v338_v30 = vpop.eup %337  ;;  %v61_v31 = vadd.f32 1e-05, %v59_v29 }
  0xfd   :  { %v74_v32 = vmul.f32 %v338_v30, %v62_v26  ;;  %vm80_vm2 = vweird.f32 %v338_v30 }
  0xfe   :  { %339 = vrsqrt.f32 %v61_v31  ;;  %vm81_vm4 = vmor %vm79_vm3, %vm80_vm2  ;;  %vm69_vm6 = vweird.f32 %v61_v31 }
  0xff   :  { %v75_v33 = vmul.f32 %v338_v30, %v74_v32 }
 0x101   :  { %v76_v34 = vmul.f32 0.5, %v75_v33 }
 0x103   :  { %v77_v35 = vsub.f32 1.5, %v76_v34 }
 0x104   :  { %v340_v36 = vpop.eup %339 }
 0x105   :  { %v78_v37 = vmul.f32 %v338_v30, %v77_v35  ;;  %v64_v38 = vmul.f32 %v340_v36, %v61_v31  ;;  %vm70_vm5 = vweird.f32 %v340_v36  ;;  %v231_v31 = vld [vmem:[%s544_s5] sm:$0xff] }
 0x106   :  { %vm71_vm7 = vmor %vm69_vm6, %vm70_vm5  ;;  %325 = vmatpush.msra.mxu2 %v231_v31  ;;  %261 = vmatpush.msra.mxu1 %v231_v31 }
 0x107   :  { %v82_v40 = vsel %vm81_vm4, %v338_v30, %v78_v37  ;;  %v65_v41 = vmul.f32 %v340_v36, %v64_v38 }
 0x108   :  { %v84_v43 = vmul.f32 %v82_v40, %v50_v13 }
 0x109   :  { %v66_v44 = vmul.f32 0.5, %v65_v41  ;;  %v372_v41 = vmov 0.0  }
 0x10a   :  { %v90_v45 = vmul.f32 %v331_v39, %v84_v43  ;;  %99 = vst.msk [vmem:[#allocation3] sm:$0xff] %vm33_vm0, %v372_v41 }
 0x10b   :  { %v67_v46 = vsub.f32 1.5, %v66_v44  ;;  %100 = vst.msk [vmem:[#allocation3 + $0x8] sm:$0xff] %vm33_vm0, %v372_v41 }
 0x10c   :  { %v96_v47 = vadd.f32 %v332_v42, %v90_v45 }
 0x10d   :  { %v68_v48 = vmul.f32 %v340_v36, %v67_v46 }
 0x10e   :  { %98 = vst.msk [vmem:[#allocation2 + $0x8] sm:$0xff] %vm33_vm0, %v96_v47 }
 0x10f   :  { %v72_v49 = vsel %vm71_vm7, %v340_v36, %v68_v48 }
 0x110   :  { %v83_v50 = vmul.f32 %v72_v49, %v49_v18 }
 0x112   :  { %v89_v51 = vmul.f32 %v331_v39, %v83_v50 }
 0x114   :  { %v95_v52 = vadd.f32 %v332_v42, %v89_v51 }
 0x115   :  { %v102_v53 = vld [vmem:[#allocation2 + $0x8] sm:$0xff] }
 0x116   :  { %97 = vst.msk [vmem:[#allocation2] sm:$0xff] %vm33_vm0, %v95_v52  ;;  %309 = vmatmul.msk.f32.vlgmr.msra.gmra.mxu3 %vm33_vm0, %v102_v53 }
 0x11d   :  { %v101_v54 = vld [vmem:[#allocation2] sm:$0xff] }
 0x11e   :  { %308 = vmatmul.msk.f32.vlgmr.msra.gmra.mxu0 %vm33_vm0, %v101_v54 }
 0x199   :  { %v138_v56 = vpop.f32.mrf.mxu3 }
 0x19a   :  { %v459_v57 = vadd.f32 %v333_v55, %v138_v56 }
 0x19b   :  { %v135_v58 = vpop.f32.mrf.mxu0 }
 0x19c   :  { %v462_v59 = vmul.f32 0.70710677, %v459_v57  ;;  %v464_v60 = vadd.f32 %v333_v55, %v135_v58 }
 0x19e   :  { %v185_v61 = vmul.f32 %v462_v59, %v462_v59  ;;  %v469_v62 = vmul.f32 0.70710677, %v464_v60 }
 0x1a0   :  { %v471_v63 = vmin.f32 %v185_v61, 16.0  ;;  %v145_v1 = vmul.f32 %v469_v62, %v469_v62 }
 0x1a2   :  { %v187_v4 = vmul.f32 2.1237322e-06, %v471_v63  ;;  %v198_v5 = vmul.f32 3.8918573e-05, %v471_v63  ;;  %v480_v6 = vmin.f32 %v145_v1, 16.0 }
 0x1a4   :  { %v188_v8 = vadd.f32 0.00028619796, %v187_v4  ;;  %v199_v9 = vadd.f32 0.001143296, %v198_v5  ;;  %v147_v10 = vmul.f32 2.1237322e-06, %v480_v6 }
 0x1a5   :  { %v158_v11 = vmul.f32 3.8918573e-05, %v480_v6 }
 0x1a6   :  { %v189_v13 = vmul.f32 %v188_v8, %v471_v63  ;;  %v200_v14 = vmul.f32 %v199_v9, %v471_v63  ;;  %v148_v15 = vadd.f32 0.00028619796, %v147_v10 }
 0x1a7   :  { %v159_v16 = vadd.f32 0.001143296, %v158_v11 }
 0x1a8   :  { %v201_v18 = vadd.f32 0.014752088, %v200_v14  ;;  %v149_v19 = vmul.f32 %v148_v15, %v480_v6  ;;  %v190_v20 = vadd.f32 0.0036580483, %v189_v13 }
 0x1a9   :  { %v160_v21 = vmul.f32 %v159_v16, %v480_v6 }
 0x1aa   :  { %v202_v23 = vmul.f32 %v201_v18, %v471_v63  ;;  %v150_v25 = vadd.f32 0.0036580483, %v149_v19  ;;  %v191_v29 = vmul.f32 %v190_v20, %v471_v63  ;;  %v142_v20 = vmul.f32 0.5, %v459_v57  ;;  %v334_v57 = vld [vmem:[%s545_s6] ss:$0 sm:$0xff]  ;;  %s374_s6 = smov 128  }
 0x1ab   :  { %v161_v26 = vadd.f32 0.014752088, %v160_v21 }
 0x1ac   :  { %v203_v28 = vadd.f32 0.112945676, %v202_v23  ;;  %v151_v33 = vmul.f32 %v150_v25, %v480_v6  ;;  %v192_v36 = vadd.f32 0.05243302, %v191_v29  ;;  %v141_v23 = vmul.f32 0.5, %v464_v60 }
 0x1ad   :  { %v162_v30 = vmul.f32 %v161_v26, %v480_v6  ;;  %v229_v26 = vld [vmem:[#allocation3] sm:$0xff] }
 0x1ae   :  { %v204_v32 = vmul.f32 %v203_v28, %v471_v63  ;;  %v152_v39 = vadd.f32 0.05243302, %v151_v33  ;;  %v193_v43 = vmul.f32 %v192_v36, %v471_v63  ;;  %v230_v28 = vld [vmem:[#allocation3 + $0x8] sm:$0xff] }
 0x1af   :  { %v163_v34 = vadd.f32 0.112945676, %v162_v30 }
 0x1b0   :  { %v205_v35 = vadd.f32 0.4994258, %v204_v32  ;;  %v153_v45 = vmul.f32 %v152_v39, %v480_v6  ;;  %v194_v47 = vadd.f32 0.18741608, %v193_v43 }
 0x1b1   :  { %v164_v37 = vmul.f32 %v163_v34, %v480_v6 }
 0x1b2   :  { %v206_v38 = vmul.f32 %v205_v35, %v471_v63  ;;  %v154_v48 = vadd.f32 0.18741608, %v153_v45  ;;  %v195_v50 = vmul.f32 %v194_v47, %v471_v63 }
 0x1b3   :  { %v165_v40 = vadd.f32 0.4994258, %v164_v37 }
 0x1b4   :  { %v207_v42 = vadd.f32 1.0, %v206_v38  ;;  %v155_v54 = vmul.f32 %v154_v48, %v480_v6  ;;  %v196_v58 = vadd.f32 1.1283791, %v195_v50 }
 0x1b5   :  { %v166_v44 = vmul.f32 %v165_v40, %v480_v6 }
 0x1b6   :  { %341 = vrcp.f32 %v207_v42  ;;  %v219_v55 = vand.u32 2147483648, %v207_v42  ;;  %v217_v1 = vand.u32 2147483647, %v207_v42  ;;  %vm213_vm9 = vweird.f32 %v207_v42 }
 0x1b7   :  { %v167_v46 = vadd.f32 1.0, %v166_v44  ;;  %v156_v5 = vadd.f32 1.1283791, %v155_v54  ;;  %v197_v10 = vmul.f32 %v196_v58, %v462_v59 }
 0x1b8   :  { %v220_v8 = vor.u32 1.1754944e-38, %v219_v55  ;;  %vm218_vm12 = vcmp.eq.f32.partialorder %v217_v1, 8.507059e+37 }
 0x1b9   :  { %343 = vrcp.f32 %v167_v46  ;;  %v179_v7 = vand.u32 2147483648, %v167_v46  ;;  %v177_v63 = vand.u32 2147483647, %v167_v46  ;;  %vm173_vm13 = vweird.f32 %v167_v46 }
 0x1ba   :  { %v157_v15 = vmul.f32 %v156_v5, %v469_v62 }
 0x1bb   :  { %v180_v14 = vor.u32 1.1754944e-38, %v179_v7  ;;  %vm178_vm15 = vcmp.eq.f32.partialorder %v177_v63, 8.507059e+37 }
 0x1bc   :  { %v342_v49 = vpop.eup %341 }
 0x1bd   :  { %v209_v51 = vmul.f32 %v342_v49, %v207_v42  ;;  %vm214_vm8 = vweird.f32 %v342_v49 }
 0x1be   :  { %vm215_vm10 = vmor %vm213_vm9, %vm214_vm8 }
 0x1bf   :  { %v344_v52 = vpop.eup %343  ;;  %v210_v53 = vsub.f32 1.0, %v209_v51 }
 0x1c0   :  { %v169_v56 = vmul.f32 %v344_v52, %v167_v46  ;;  %vm174_vm11 = vweird.f32 %v344_v52 }
 0x1c1   :  { %v211_v61 = vmul.f32 %v342_v49, %v210_v53  ;;  %vm175_vm14 = vmor %vm173_vm13, %vm174_vm11 }
 0x1c2   :  { %v170_v3 = vsub.f32 1.0, %v169_v56 }
 0x1c3   :  { %v212_v4 = vadd.f32 %v342_v49, %v211_v61 }
 0x1c4   :  { %v171_v9 = vmul.f32 %v344_v52, %v170_v3 }
 0x1c5   :  { %v216_v11 = vsel %vm215_vm10, %v342_v49, %v212_v4 }
 0x1c6   :  { %v221_v6 = vsel %vm218_vm12, %v220_v8, %v216_v11  ;;  %v172_v12 = vadd.f32 %v344_v52, %v171_v9 }
 0x1c7   :  { %v222_v13 = vmul.f32 %v221_v6, %v197_v10 }
 0x1c8   :  { %v176_v16 = vsel %vm175_vm14, %v344_v52, %v172_v12 }
 0x1c9   :  { %v181_v17 = vsel %vm178_vm15, %v180_v14, %v176_v16  ;;  %v311_v18 = vclamps-f32 %v222_v13, 1.0 }
 0x1ca   :  { %v182_v19 = vmul.f32 %v181_v17, %v157_v15 }
 0x1cb   :  { %v226_v21 = vadd.f32 1.0, %v311_v18 }
 0x1cc   :  { %v310_v59 = vclamps-f32 %v182_v19, 1.0 }
 0x1cd   :  { %v228_v22 = vmul.f32 %v226_v21, %v142_v20 }
 0x1ce   :  { %v225_v24 = vadd.f32 1.0, %v310_v59 }
 0x1cf   :  { %313 = vmatmul.msk.f32.vlgmr.msra.gmra.mxu2 %vm239_vm1, %v228_v22 }
 0x1d0   :  { %v227_v25 = vmul.f32 %v225_v24, %v141_v23 }
 0x1d2   :  { %312 = vmatmul.msk.f32.vlgmr.msra.gmra.mxu1 %vm239_vm1, %v227_v25 }
 0x24f   :  { %v263_v27 = vpop.f32.mrf.mxu1 }
 0x250   :  { %v269_v62 = vadd.f32 %v263_v27, %v229_v26 }
 0x252   :  { %271 = vst.msk [vmem:[#allocation3] sm:$0xff] %vm33_vm0, %v269_v62  ;;  %v266_v29 = vpop.f32.mrf.mxu2 }
 0x253   :  { %v270_v30 = vadd.f32 %v266_v29, %v230_v28 }
 0x255   :  { %272 = vst.msk [vmem:[#allocation3 + $0x8] sm:$0xff] %vm33_vm0, %v270_v30 }
 0x259   :  { %v276_v31 = vld [vmem:[#allocation3] sm:$0xff] }
 0x25a   :  { %v282_v60 = vadd.f32 %v334_v57, %v276_v31 }
 0x25c   :  { %v277_v32 = vld [vmem:[#allocation3 + $0x8] sm:$0xff]  ;;  %v286_v33 = vadd.f32 %v282_v60, %v426_v2 }
 0x25d   :  { %v283_v34 = vadd.f32 %v334_v57, %v277_v32 }
 0x25e   :  { %288 = vst.msk [vmem:[#allocation4] sm:$0xff] %vm33_vm0, %v286_v33 }
 0x25f   :  { %v287_v35 = vadd.f32 %v283_v34, %v419_v0 }
 0x261   :  { %289 = vst.msk [vmem:[#allocation4 + $0x8] sm:$0xff] %vm33_vm0, %v287_v35 }
 0x262   :  { %302 = dma.vmem_to_hbm [thread:$0]  %s295_s8, 256, %s297_s11, [#allocation5], %s374_s6, %s374_s6, %s375_s12  }
 0x263   :  { %369 = dma.done.wait [#allocation5], 256  }
 0x264   :  { %370 = vsyncadd [#allocation5], 4294967040 }
 0x265   :  { %307 = vsyncpa [#allocation5], 1 }

</bundles_post_ra>
